<compile_context>
chip_gen: v7x
topology: tpu7x:2x2x1
jax: 0.10.0
libtpu: 0.0.40
codegen_flags: <defaults>
</compile_context>

<pallas_src>
import functools
import math

import jax
import jax.numpy as jnp
from jax.experimental import pallas as pl
from jax.experimental.pallas import tpu as pltpu


# ----------------------------------------------------------------------------
# Kernel: one block of `block_b` batch elements per grid step.
#   x_ref    : (block_b, T, N)         input tile, original dtype (f32)
#   wqkv_ref : (N, padded_cols)        fused [Wq^T * scale | Wk^T | Wv^T | 0pad]
#   o_ref    : (block_b, T, N)         output tile
# ----------------------------------------------------------------------------
def _attention_kernel(x_ref, wqkv_ref, o_ref, *, block_b, tokens, n_embed,
                      mxu_dtype):
    xb = x_ref[...]                                           # (Bt, T, N) f32
    rows = block_b * tokens

    # Fused QKV projection: merge leading dims so the MXU sees one
    # (Bt*T, N) x (N, padded_cols) matmul (leading-dim reshape only).
    x2 = xb.reshape(rows, n_embed).astype(mxu_dtype)
    qkv = jnp.dot(x2, wqkv_ref[...], preferred_element_type=jnp.float32)

    q = qkv[:, 0:n_embed].reshape(block_b, tokens, n_embed)   # scale folded in
    k = qkv[:, n_embed:2 * n_embed].reshape(block_b, tokens, n_embed)
    v = qkv[:, 2 * n_embed:3 * n_embed].reshape(block_b, tokens, n_embed)

    # score = (q*scale) @ k^T, contracting last dims (no explicit k.T / XLU).
    s = jnp.einsum("btn,bsn->bts",
                   q.astype(mxu_dtype), k.astype(mxu_dtype),
                   preferred_element_type=jnp.float32)        # (Bt, T, T) f32

    # Numerically-stable softmax in f32.
    s = s - jnp.max(s, axis=-1, keepdims=True)
    p = jnp.exp(s)
    denom = jnp.sum(p, axis=-1, keepdims=True)
    r = pl.reciprocal(denom, approx=True)                     # EUP vrcp
    r = r * (2.0 - denom * r)                                 # Newton -> ~f32
    p = p * r

    out = jnp.einsum("bts,bsn->btn",
                     p.astype(mxu_dtype), v.astype(mxu_dtype),
                     preferred_element_type=jnp.float32)      # (Bt, T, N)
    o_ref[...] = out.astype(o_ref.dtype)


# ----------------------------------------------------------------------------
# Generation-aware blocking
# ----------------------------------------------------------------------------
def _tpu_kind():
    try:
        d = jax.devices()[0]
        if d.platform != "tpu":
            return ""
        return d.device_kind.lower()
    except Exception:
        return ""


def _choose_blocking(batch, tokens, *, target_rows, min_grid_steps):
    """Pick (block_b, grid_steps, padded_batch).

    block_b is sized so block_b*T ~ target_rows (per-step overhead amortized,
    MXU sublanes filled).  Non-divisible / prime batches are handled by
    padding up to grid_steps * block_b (no block_b=1 cliff)."""
    block_b = max(1, min(batch, max(1, target_rows // tokens)))
    grid = pl.cdiv(batch, block_b)
    if grid < min_grid_steps and batch >= min_grid_steps:
        grid = min_grid_steps
        block_b = pl.cdiv(batch, grid)
    return block_b, grid, grid * block_b


# ----------------------------------------------------------------------------
# Wrapper
# ----------------------------------------------------------------------------
def attention_forward(x, wq, wk, wv, *, mode="vanilla", mxu_dtype=None):
    """Pallas version of Attention.forward (vanilla / spatial).

    x        : (B, T, N) float32
    wq/wk/wv : (N, N) nn.Linear weights, layout (out_features, in_features)
    mxu_dtype: dtype fed to the MXU (None -> bf16; f32 accumulation always).
    """
    if mode not in ("vanilla", "spatial"):
        # TODO(synk): 'temporal' mode (per-head attention over frames) is not
        # implemented as a Pallas kernel; vanilla/spatial (identical math) only.
        raise NotImplementedError("only vanilla/spatial modes are implemented")

    if mxu_dtype is None:
        mxu_dtype = jnp.bfloat16

    B, T, N = x.shape
    scale = 1.0 / math.sqrt(N)

    # Fused, pre-transposed QKV weight with the score scale folded into Wq,
    # padded on the lane (column) axis to a multiple of 128 so the projection
    # output fills whole vregs.  Weight is tiny; wrapper-side cast is free.
    w_qkv = jnp.concatenate([wq.T * scale, wk.T, wv.T], axis=1)   # (N, 3N)
    cols = 3 * N
    padded_cols = ((cols + 127) // 128) * 128
    if padded_cols != cols:
        w_qkv = jnp.pad(w_qkv, ((0, 0), (0, padded_cols - cols)))
    w_qkv = w_qkv.astype(mxu_dtype)

    # Generation-aware blocking: v7x has 2 TensorCores (want >=2 grid steps)
    # and only 64 MiB VMEM; v5e/v6e have 1 TC, so never split just for the
    # grid.  NOTE: x itself is NOT cast here -- the kernel reads f32 directly.
    kind = _tpu_kind()
    is_v7 = "v7" in kind
    target_rows = 1024 if is_v7 else 2048
    min_grid_steps = 2 if is_v7 else 1
    vmem_limit = (48 << 20) if is_v7 else (64 << 20)

    block_b, grid_steps, b_padded = _choose_blocking(
        B, T, target_rows=target_rows, min_grid_steps=min_grid_steps)

    x_in = x
    if b_padded != B:
        x_in = jnp.pad(x, ((0, b_padded - B), (0, 0), (0, 0)))

    kernel = functools.partial(_attention_kernel, block_b=block_b, tokens=T,
                               n_embed=N, mxu_dtype=mxu_dtype)

    itemsize = jnp.dtype(x.dtype).itemsize
    cost = pl.CostEstimate(
        flops=b_padded * (2 * T * N * cols + 4 * T * T * N),
        transcendentals=b_padded * T * T,
        bytes_accessed=2 * b_padded * T * N * itemsize
        + N * padded_cols * jnp.dtype(mxu_dtype).itemsize,
    )

    out = pl.pallas_call(
        kernel,
        out_shape=jax.ShapeDtypeStruct((b_padded, T, N), x.dtype),
        grid_spec=pltpu.PrefetchScalarGridSpec(
            num_scalar_prefetch=0,
            grid=(grid_steps,),
            in_specs=[
                pl.BlockSpec((block_b, T, N), lambda b: (b, 0, 0)),     # x tile
                pl.BlockSpec((N, padded_cols), lambda b: (0, 0)),       # fused W
            ],
            out_specs=pl.BlockSpec((block_b, T, N), lambda b: (b, 0, 0)),
        ),
        compiler_params=pltpu.CompilerParams(
            dimension_semantics=("parallel",),
            vmem_limit_bytes=vmem_limit,
        ),
        cost_estimate=cost,
    )(x_in, w_qkv)

    if b_padded != B:
        out = out[:B]
    return out


# ----------------------------------------------------------------------------
# Pure-JAX reference (mirrors the PyTorch vanilla_attention exactly)
# ----------------------------------------------------------------------------
def attention_reference(x, wq, wk, wv):
    B, T, N = x.shape
    q = x @ wq.T
    k = x @ wk.T
    v = x @ wv.T
    score = (q @ jnp.swapaxes(k, -2, -1)) / (N ** 0.5)
    score = jax.nn.softmax(score, axis=-1)
    return score @ v


if __name__ == "__main__":
    # Shapes consistent with the module: B=2, T=8 tokens, embed_size=32,
    # heads=4 (heads only matter for the unimplemented temporal mode).
    B, T, embed_size, heads = 2, 8, 32, 4

    key = jax.random.PRNGKey(0)
    kx, kq, kk, kv, kx2, kx3 = jax.random.split(key, 6)

    x = jax.random.normal(kx, (B, T, embed_size), dtype=jnp.float32)

    bound = 1.0 / math.sqrt(embed_size)
    wq = jax.random.uniform(kq, (embed_size, embed_size), jnp.float32, -bound, bound)
    wk = jax.random.uniform(kk, (embed_size, embed_size), jnp.float32, -bound, bound)
    wv = jax.random.uniform(kv, (embed_size, embed_size), jnp.float32, -bound, bound)

    ref = attention_reference(x, wq, wk, wv)

    # f32 MXU path: near-exact vs reference.
    out_f32 = jax.block_until_ready(
        attention_forward(x, wq, wk, wv, mode="vanilla", mxu_dtype=jnp.float32))
    assert out_f32.shape == (B, T, embed_size)
    assert jnp.allclose(out_f32, ref, atol=1e-4, rtol=1e-4), "f32 mismatch vs reference"

    # bf16-fed MXU path (f32 accumulate / f32 softmax): looser tolerance.
    out_bf16 = jax.block_until_ready(
        attention_forward(x, wq, wk, wv, mode="vanilla", mxu_dtype=jnp.bfloat16))
    assert jnp.allclose(out_bf16, ref, atol=5e-2, rtol=5e-2), "bf16 mismatch vs reference"

    # Batched-rows path: many batch elements in one grid step.
    B2 = 16
    x_big = jax.random.normal(kx2, (B2, T, embed_size), dtype=jnp.float32)
    ref_big = attention_reference(x_big, wq, wk, wv)
    out_big = jax.block_until_ready(
        attention_forward(x_big, wq, wk, wv, mode="spatial", mxu_dtype=jnp.bfloat16))
    assert out_big.shape == (B2, T, embed_size)
    assert jnp.allclose(out_big, ref_big, atol=5e-2, rtol=5e-2), "batched mismatch"

    # Padding path: batch not divisible by the chosen block (exercises
    # grid*block_b padding + result slicing).
    B3 = 300
    x_pad = jax.random.normal(kx3, (B3, T, embed_size), dtype=jnp.float32)
    ref_pad = attention_reference(x_pad, wq, wk, wv)
    out_pad = jax.block_until_ready(
        attention_forward(x_pad, wq, wk, wv, mode="vanilla", mxu_dtype=jnp.bfloat16))
    assert out_pad.shape == (B3, T, embed_size)
    assert jnp.allclose(out_pad, ref_pad, atol=5e-2, rtol=5e-2), "padded-batch mismatch"

    print("KERNEL_OK")
</pallas_src>

<mosaic_0001>
module attributes {stable_mosaic.version = 11 : i64} {
  func.func @_attention_kernel(%arg0: i32, %arg1: memref<2x8x32xf32, #tpu.memory_space<vmem>>, %arg2: memref<32x128xf32, #tpu.memory_space<vmem>>, %arg3: memref<2x8x32xf32, #tpu.memory_space<vmem>>) attributes {dimension_semantics = [#tpu.dimension_semantics<parallel>], iteration_bounds = array<i64: 1>, scalar_prefetch = 0 : i64, scratch_operands = 0 : i64, tpu.core_type = #tpu.core_type<tc>, window_params = [{transform_indices = @transform_0, window_bounds = array<i64: 2, 8, 32>}, {pipeline_mode = #tpu.pipeline_mode<synchronous>, transform_indices = @transform_1, window_bounds = array<i64: 32, 128>}, {transform_indices = @transform_2, window_bounds = array<i64: 2, 8, 32>}]} {
    %c0 = arith.constant 0 : index
    %c0_0 = arith.constant 0 : index
    %c0_1 = arith.constant 0 : index
    %0 = vector.load %arg1[%c0, %c0_0, %c0_1] : memref<2x8x32xf32, #tpu.memory_space<vmem>>, vector<2x8x32xf32>
    %1 = vector.shape_cast %0 : vector<2x8x32xf32> to vector<16x32xf32>
    %c0_2 = arith.constant 0 : index
    %c0_3 = arith.constant 0 : index
    %2 = vector.load %arg2[%c0_2, %c0_3] : memref<32x128xf32, #tpu.memory_space<vmem>>, vector<32x128xf32>
    %cst = arith.constant dense<0.000000e+00> : vector<16x128xf32>
    %3 = tpu.matmul %1, %2, %cst {dimension_numbers = #tpu.dot_dimension_numbers<[1], [0], [0], [1], [0, 0, 1, 1], [], []>} : vector<16x32xf32>, vector<32x128xf32>, vector<16x128xf32> -> vector<16x128xf32>
    %4 = vector.extract_strided_slice %3 {offsets = [0, 0], sizes = [16, 32], strides = [1, 1]} : vector<16x128xf32> to vector<16x32xf32>
    %5 = vector.shape_cast %4 : vector<16x32xf32> to vector<2x8x32xf32>
    %6 = vector.extract_strided_slice %3 {offsets = [0, 32], sizes = [16, 32], strides = [1, 1]} : vector<16x128xf32> to vector<16x32xf32>
    %7 = vector.shape_cast %6 : vector<16x32xf32> to vector<2x8x32xf32>
    %8 = vector.extract_strided_slice %3 {offsets = [0, 64], sizes = [16, 32], strides = [1, 1]} : vector<16x128xf32> to vector<16x32xf32>
    %9 = vector.shape_cast %8 : vector<16x32xf32> to vector<2x8x32xf32>
    "tpu.trace_start"() <{level = 10 : i32, message = "btn,bsn->bts"}> : () -> ()
    %cst_4 = arith.constant dense<0.000000e+00> : vector<2x8x8xf32>
    %10 = tpu.matmul %5, %7, %cst_4 {dimension_numbers = #tpu.dot_dimension_numbers<[2], [2], [1], [1], [0, 0, 0, 1, 1, 1], [0], [0]>} : vector<2x8x32xf32>, vector<2x8x32xf32>, vector<2x8x8xf32> -> vector<2x8x8xf32>
    "tpu.trace_stop"() : () -> ()
    %cst_5 = arith.constant dense<0xFF800000> : vector<2x8xf32>
    %11 = vector.multi_reduction <maximumf>, %10, %cst_5 [2] : vector<2x8x8xf32> to vector<2x8xf32>
    %12 = vector.shape_cast %11 : vector<2x8xf32> to vector<2x8x1xf32>
    %13 = vector.broadcast %12 : vector<2x8x1xf32> to vector<2x8x8xf32>
    %14 = arith.subf %10, %13 : vector<2x8x8xf32>
    %15 = math.exp %14 : vector<2x8x8xf32>
    %cst_6 = arith.constant dense<0.000000e+00> : vector<2x8xf32>
    %16 = vector.multi_reduction <add>, %15, %cst_6 [2] : vector<2x8x8xf32> to vector<2x8xf32>
    %17 = vector.shape_cast %16 : vector<2x8xf32> to vector<2x8x1xf32>
    %18 = tpu.reciprocal %17 {approx = true} : vector<2x8x1xf32> -> vector<2x8x1xf32>
    %19 = arith.mulf %17, %18 : vector<2x8x1xf32>
    %cst_7 = arith.constant 2.000000e+00 : f32
    %20 = vector.broadcast %cst_7 : f32 to vector<2x8x1xf32>
    %21 = arith.subf %20, %19 : vector<2x8x1xf32>
    %22 = arith.mulf %18, %21 : vector<2x8x1xf32>
    %23 = vector.broadcast %22 : vector<2x8x1xf32> to vector<2x8x8xf32>
    %24 = arith.mulf %15, %23 : vector<2x8x8xf32>
    "tpu.trace_start"() <{level = 10 : i32, message = "bts,bsn->btn"}> : () -> ()
    %cst_8 = arith.constant dense<0.000000e+00> : vector<2x8x32xf32>
    %25 = tpu.matmul %24, %9, %cst_8 {dimension_numbers = #tpu.dot_dimension_numbers<[2], [1], [1], [2], [0, 0, 0, 1, 1, 2], [0], [0]>} : vector<2x8x8xf32>, vector<2x8x32xf32>, vector<2x8x32xf32> -> vector<2x8x32xf32>
    "tpu.trace_stop"() : () -> ()
    %c0_9 = arith.constant 0 : index
    %c0_10 = arith.constant 0 : index
    %c0_11 = arith.constant 0 : index
    %26 = vector.load %arg3[%c0_9, %c0_10, %c0_11] : memref<2x8x32xf32, #tpu.memory_space<vmem>>, vector<2x8x32xf32>
    tpu.vector_store %arg3[%c0_9, %c0_10, %c0_11], %25 {strides = array<i32>} : memref<2x8x32xf32, #tpu.memory_space<vmem>>, vector<2x8x32xf32>,
    return
  }
  func.func @transform_0(%arg0: i32) -> (i32, i32, i32) {
    %c0_i32 = arith.constant 0 : i32
    %c0_i32_0 = arith.constant 0 : i32
    %c0_i32_1 = arith.constant 0 : i32
    return %arg0, %c0_i32, %c0_i32_0 : i32, i32, i32
  }
  func.func @transform_1(%arg0: i32) -> (i32, i32) {
    %c0_i32 = arith.constant 0 : i32
    %c0_i32_0 = arith.constant 0 : i32
    %c0_i32_1 = arith.constant 0 : i32
    return %c0_i32, %c0_i32_0 : i32, i32
  }
  func.func @transform_2(%arg0: i32) -> (i32, i32, i32) {
    %c0_i32 = arith.constant 0 : i32
    %c0_i32_0 = arith.constant 0 : i32
    %c0_i32_1 = arith.constant 0 : i32
    return %arg0, %c0_i32, %c0_i32_0 : i32, i32, i32
  }
}

</mosaic_0001>

<bundles_post_ra>
// kernel: tpu_custom_call.1
= control target key start
LH: loop header
LB: loop body
LE: loop exit
PB: predicated region body
PF: predicated region fallthrough
CT: control target
= control target key end

     0   :  { %7 = vsyncpa [#allocation3], 0  ;;  %s720_s0 = inlined_call_operand.hbm [shape: f32[2,8,32], index: 0, kind: input, shape index: {}]   ;;  %s721_s1 = inlined_call_operand.hbm [shape: f32[32,128], index: 1, kind: input, shape index: {}]   ;;  %s722_s2 = inlined_call_operand.hbm [shape: f32[2,8,32], index: 2, kind: output, shape index: {}]  }
   0x1   :  { %8 = vsyncpa [#allocation6], 0 }
   0x2   :  { %9 = vsyncpa [#allocation4], 0  ;;  %s633_s9 = smov [#allocation2]   ;;  %s561_s13 = scalar_lea.hbm %s720_s0, 256 }
   0x3   :  { %s15_s10 = sshll.u32 %s633_s9, 4  ;;  %p562_p0 = scmp.ne.s32.totalorder %s720_s0, %s561_s13  ;;  %s16_s10 = int_to_ptr.vmem [resolvable:$true] %s15_s10 }
   0x4   :  { %p565_p1 = scmp.lt.u32.totalorder %s561_s13, %s720_s0 }
   0x6   :  { %p567_p2 = pnand %p565_p1, %p562_p0 }
   0x8   :  { %570 = shalt.err (!%p567_p2)
}
   0x9   :  { %s571_s18 = scalar_lea.vmem %s16_s10, 256  ;;  %p576_p4 = scmp.lt.s32.totalorder %s16_s10, %s16_s10 }
   0xa   :  { %p572_p3 = scmp.ne.s32.totalorder %s16_s10, %s571_s18  ;;  %p577_p5 = scmp.lt.s32.totalorder %s571_s18, %s571_s18 }
   0xc   :  { %p578_p6 = por %p577_p5, %p576_p4 }
   0xe   :  { %p579_p7 = pnand %p578_p6, %p572_p3 }
  0x10   :  { %582 = shalt.err (!%p579_p7)
}
  0x11   :  { %s634_s19 = smov 128   ;;  %s635_s20 = smov 8  }
  0x12   :  { %21 = dma.hbm_to_vmem [thread:$0]  %s720_s0, 256, %s16_s10, [#allocation3], %s634_s19, %s634_s19, %s635_s20  }
  0x13   :  { %s636_s23 = smov [#allocation5]   ;;  %s583_s27 = scalar_lea.hbm %s721_s1, 512 }
  0x14   :  { %s27_s24 = sshll.u32 %s636_s23, 4  ;;  %p584_p8 = scmp.ne.s32.totalorder %s721_s1, %s583_s27  ;;  %s28_s24 = int_to_ptr.vmem [resolvable:$true] %s27_s24 }
  0x15   :  { %p587_p9 = scmp.lt.u32.totalorder %s583_s27, %s721_s1 }
  0x17   :  { %p589_p10 = pnand %p587_p9, %p584_p8 }
  0x19   :  { %592 = shalt.err (!%p589_p10)
}
  0x1a   :  { %s593_s4 = scalar_lea.vmem %s28_s24, 512  ;;  %p598_p12 = scmp.lt.s32.totalorder %s28_s24, %s28_s24 }
  0x1b   :  { %p594_p11 = scmp.ne.s32.totalorder %s28_s24, %s593_s4  ;;  %p599_p13 = scmp.lt.s32.totalorder %s593_s4, %s593_s4 }
  0x1d   :  { %p600_p0 = por %p599_p13, %p598_p12 }
  0x1f   :  { %p601_p1 = pnand %p600_p0, %p594_p11 }
  0x21   :  { %604 = shalt.err (!%p601_p1)
}
  0x22   :  { %33 = dma.hbm_to_vmem [thread:$0]  %s721_s1, 512, %s28_s24, [#allocation6], %s634_s19, %s634_s19, %s635_s20  }
  0x23   :  { %627 = dma.done.wait [#allocation3], 256  }
  0x24   :  { %628 = vsyncadd [#allocation3], 4294967040 }
  0x25   :  { %629 = dma.done.wait [#allocation6], 512  }
  0x26   :  { %630 = vsyncadd [#allocation6], 4294966784  ;;  %vm46_vm0 = vcmask 261120   ;;  %v42_v0 = vld [vmem:[#allocation5] sm:$0xff]  ;;  %v43_v1 = vld [vmem:[#allocation5 + $0x8] sm:$0xff]  ;;  %v637_v8 = vmov 0.0  }
  0x27   :  { %v44_v2 = vld [vmem:[#allocation5 + $0x10] sm:$0xff]  ;;  %v536_v3 = vpack.c.bf16 %v43_v1, %v42_v0  ;;  %v45_v4 = vld [vmem:[#allocation5 + $0x18] sm:$0xff]  ;;  %516 = vmatprep.subr.mxu1 %v637_v8  ;;  %vm638_vm1 = vmmov 0   ;;  %s639_s1 = smov 96   ;;  %vm282_vm2 = vcmask 64512   ;;  %s640_s6 = smov 64  }
  0x28   :  { %v40_v5 = vld [vmem:[#allocation2] sm:$0xff]  ;;  %v540_v6 = vpack.c.bf16 %v45_v4, %v44_v2  ;;  %v41_v7 = vld [vmem:[#allocation2 + $0x8] sm:$0xff]  ;;  %518 = vmatprep.mubr.msk.f32.mxu1 %vm638_vm1, %v637_v8  ;;  %s641_s7 = smov [#allocation7]  }
  0x29   :  { %513 = vmatprep.mubr.msk.f32.mxu0 %vm46_vm0, %v40_v5  ;;  %537 = vmatprep.subr.bf16.mxu0 %v536_v3  ;;  %s470_s8 = sshll.u32 %s641_s7, 4  ;;  %s471_s8 = int_to_ptr.vmem [resolvable:$true] %s470_s8 }
  0x2a   :  { %539 = vmatpush3.bf16.msra.mxu0 %v536_v3  ;;  %s605_s9 = scalar_lea.vmem %s471_s8, 256  ;;  %p610_p3 = scmp.lt.s32.totalorder %s471_s8, %s471_s8 }
  0x2b   :  { %541 = vmatprep.subr.bf16.mxu0 %v540_v6  ;;  %p606_p2 = scmp.ne.s32.totalorder %s471_s8, %s605_s9  ;;  %p611_p4 = scmp.lt.s32.totalorder %s605_s9, %s605_s9 }
  0x2d   :  { %p612_p5 = por %p611_p4, %p610_p3 }
  0x2e   :  { %543 = vmatpush3.bf16.msra.mxu0 %v540_v6 }
  0x2f   :  { %526 = vmatprep.subr.mxu0 %v637_v8  ;;  %p613_p6 = pnand %p612_p5, %p606_p2 }
  0x31   :  { %514 = vmatmul.mubr.msk.f32.vlgmr.msra.gmra.mrb[0].mxu0 %vm46_vm0, %v41_v7 }
  0x32   :  { %528 = vmatprep.mubr.msk.f32.mxu0 %vm638_vm1, %v637_v8 }
 0x104   :  { %v515_v9 = vpop.f32.mrb[0].mxu0 }
 0x105   :  { %v119_v10 = vpop.f32.mrb[1].mxu0 }
 0x106   :  { %129 = vrot.lane.b32.xlu0 %v119_v10, %s639_s1 }
 0x10a   :  { %206 = vrot.lane.b32.xlu0 %v515_v9, %s639_s1 }
 0x178   :  { %v130_v11 = vpop.permute.xlu0 %129 }
 0x179   :  { %517 = vmatpush3.xpose.msk.msra.mxu1 %vm46_vm0, %v130_v11 }
 0x17a   :  { %521 = vmatprep.subr.mxu1 %v637_v8 }
 0x17c   :  { %519 = vmatmul.mubr.msk.f32.vlgmr.msra.gmra.mrb[0].mxu1 %vm46_vm0, %v119_v10  ;;  %v207_v12 = vpop.permute.xlu0 %206 }
 0x17d   :  { %522 = vmatpush3.xpose.msk.msra.mxu1 %vm46_vm0, %v207_v12  ;;  %523 = vmatprep.mubr.msk.f32.mxu1 %vm638_vm1, %v637_v8 }
 0x17e   :  { %531 = vmatprep.subr.mxu1 %v637_v8 }
 0x180   :  { %524 = vmatmul.mubr.msk.f32.vlgmr.msra.gmra.mrb[2].mxu1 %vm46_vm0, %v515_v9 }
 0x181   :  { %533 = vmatprep.mubr.msk.f32.mxu1 %vm638_vm1, %v637_v8 }
 0x24f   :  { %v201_v13 = vpop.f32.mrb[0].mxu1 }
 0x250   :  { %v520_v14 = vpop.f32.mrb[1].mxu1  ;;  %v283_v15 = vsel %vm282_vm2, %v201_v13, -inf }
 0x251   :  { %284 = vmax.xlane.f32.xlu1 %v283_v15 }
 0x253   :  { %v278_v16 = vpop.f32.mrb[2].mxu1 }
 0x254   :  { %v525_v17 = vpop.f32.mrb[3].mxu1  ;;  %v286_v18 = vsel %vm282_vm2, %v278_v16, -inf }
 0x255   :  { %287 = vmax.xlane.f32.xlu1 %v286_v18 }
 0x266   :  { %311 = vrot.lane.b32.xlu1 %v119_v10, %s640_s6 }
 0x2de   :  { %v285_v19 = vpop.xlane.xlu1 %284 }
 0x2df   :  { %v289_v20 = vsub.f32 %v201_v13, %v285_v19 }
 0x2e1   :  { %v291_v21 = vmul.f32 1.442695, %v289_v20 }
 0x2e2   :  { %v288_v22 = vpop.xlane.xlu1 %287 }
 0x2e3   :  { %553 = vpow2.f32 %v291_v21  ;;  %v290_v23 = vsub.f32 %v278_v16, %v288_v22 }
 0x2e5   :  { %v293_v24 = vmul.f32 1.442695, %v290_v23 }
 0x2e6   :  { %v312_v25 = vpop.permute.xlu1 %311 }
 0x2e7   :  { %555 = vpow2.f32 %v293_v24  ;;  %527 = vmatpush3.msra.mxu0 %v312_v25 }
 0x2ed   :  { %v554_v26 = vpop.eup %553 }
 0x2ee   :  { %v295_v27 = vsel %vm282_vm2, %v554_v26, 0.0 }
 0x2ef   :  { %296 = vadd.xlane.f32.xlu0 %v295_v27 }
 0x2f1   :  { %v556_v28 = vpop.eup %555 }
 0x2f2   :  { %v298_v29 = vsel %vm282_vm2, %v556_v28, 0.0 }
 0x2f3   :  { %299 = vadd.xlane.f32.xlu1 %v298_v29 }
 0x304   :  { %387 = vrot.lane.b32.xlu1 %v515_v9, %s640_s6 }
 0x37c   :  { %v297_v30 = vpop.xlane.xlu0 %296 }
 0x37d   :  { %557 = vrcp.f32 %v297_v30 }
 0x380   :  { %v300_v31 = vpop.xlane.xlu1 %299 }
 0x381   :  { %559 = vrcp.f32 %v300_v31 }
 0x384   :  { %v388_v32 = vpop.permute.xlu1 %387 }
 0x385   :  { %532 = vmatpush3.msra.mxu1 %v388_v32 }
 0x387   :  { %v558_v33 = vpop.eup %557 }
 0x388   :  { %v303_v34 = vmul.f32 %v558_v33, %v297_v30 }
 0x38a   :  { %v305_v35 = vsub.f32 2.0, %v303_v34 }
 0x38b   :  { %v560_v36 = vpop.eup %559 }
 0x38c   :  { %v307_v37 = vmul.f32 %v558_v33, %v305_v35  ;;  %v304_v38 = vmul.f32 %v560_v36, %v300_v31 }
 0x38e   :  { %v309_v39 = vmul.f32 %v554_v26, %v307_v37  ;;  %v306_v40 = vsub.f32 2.0, %v304_v38 }
 0x390   :  { %v308_v41 = vmul.f32 %v560_v36, %v306_v40  ;;  %529 = vmatmul.mubr.msk.f32.vlgmr.msra.gmra.mrb[2].mxu0 %vm282_vm2, %v309_v39 }
 0x392   :  { %v310_v42 = vmul.f32 %v556_v28, %v308_v41 }
 0x394   :  { %534 = vmatmul.mubr.msk.f32.vlgmr.msra.gmra.mrb[4].mxu1 %vm282_vm2, %v310_v42 }
 0x463   :  { %v383_v43 = vpop.f32.mrb[2].mxu0 }
 0x464   :  { %463 = vst.msk [vmem:[#allocation7] sm:$0xff] %vm46_vm0, %v383_v43  ;;  %v530_v44 = vpop.f32.mrb[3].mxu0 }
 0x467   :  { %v459_v45 = vpop.f32.mrb[4].mxu1 }
 0x468   :  { %464 = vst.msk [vmem:[#allocation7 + $0x8] sm:$0xff] %vm46_vm0, %v459_v45  ;;  %v535_v46 = vpop.f32.mrb[5].mxu1 }
 0x469   :  { %616 = shalt.err (!%p613_p6)
}
 0x46a   :  { %s617_s12 = scalar_lea.hbm %s722_s2, 256 }
 0x46b   :  { %p618_p7 = scmp.ne.s32.totalorder %s722_s2, %s617_s12  ;;  %p621_p8 = scmp.lt.u32.totalorder %s617_s12, %s722_s2 }
 0x46d   :  { %p623_p9 = pnand %p621_p8, %p618_p7 }
 0x46f   :  { %626 = shalt.err (!%p623_p9)
}
 0x470   :  { %476 = dma.vmem_to_hbm [thread:$0]  %s471_s8, 256, %s722_s2, [#allocation4], %s634_s19, %s634_s19, %s635_s20  }
 0x471   :  { %631 = dma.done.wait [#allocation4], 256  }
 0x472   :  { %632 = vsyncadd [#allocation4], 4294967040 }
 0x473   :  { %480 = vsyncpa [#allocation3], 1 }
 0x474   :  { %481 = vsyncpa [#allocation6], 1 }
 0x475   :  { %482 = vsyncpa [#allocation4], 1 }

</bundles_post_ra>
